<compile_context>
chip_gen: v5e
topology: v5e:2x2
jax: 0.10.0
libtpu: 0.0.40
codegen_flags: <defaults>
</compile_context>

<pallas_src>
import functools

import jax
import jax.numpy as jnp
from jax.experimental import pallas as pl
from jax.experimental.pallas import tpu as pltpu

BN_EPS = 1e-5


def _round_up(v, m):
    return ((v + m - 1) // m) * m


# ----------------------------------------------------------------------------
# Kernel 1: conv (K*K shifted matmuls) + per-channel sum / sum-of-squares.
# ----------------------------------------------------------------------------
def _make_conv_stats_kernel(K, C2p, WP, LwP):
    def kernel(x_ref, w_ref, mask_ref, y_ref, ssum_ref, ssq_ref):
        n = pl.program_id(0)

        # Stats accumulators are resident outputs (constant block index):
        # initialize once, accumulate across the batch grid ("arbitrary").
        @pl.when(n == 0)
        def _init():
            ssum_ref[...] = jnp.zeros_like(ssum_ref)
            ssq_ref[...] = jnp.zeros_like(ssq_ref)

        x = x_ref[0]                                   # (C1p, Lx)  bf16
        acc = jnp.zeros((C2p, LwP), jnp.float32)
        # Conv as K*K static lane-shifted matmuls; contraction over C1p, f32
        # accumulation on the MXU, output N-dim = LwP lanes (lane-dense).
        for ky in range(K):
            for kx in range(K):
                start = ky * WP + kx
                win = x[:, start:start + LwP]          # (C1p, LwP) shifted win
                acc = acc + jnp.dot(
                    w_ref[ky * K + kx],                # (C2p, C1p)
                    win,
                    preferred_element_type=jnp.float32,
                )                                      # -> (C2p, LwP) f32

        # Zero the columns that are not real (strided / padded) outputs so the
        # BN statistics only see the valid N*OH*OW positions.
        acc = acc * mask_ref[...]
        y_ref[0] = acc

        # Per-channel reductions on the MXU (keeps the XLU free).
        ones = jnp.ones((LwP, 1), jnp.float32)
        ssum_ref[...] += jnp.dot(acc, ones, preferred_element_type=jnp.float32)
        ssq_ref[...] += jnp.dot(acc * acc, ones,
                                preferred_element_type=jnp.float32)

    return kernel


# ----------------------------------------------------------------------------
# Kernel 2: apply BatchNorm with the global statistics (per-tile, parallel).
# ----------------------------------------------------------------------------
def _make_bn_apply_kernel(inv_count, eps):
    def kernel(y_ref, ssum_ref, ssq_ref, gamma_ref, beta_ref, o_ref):
        y = y_ref[0]                                   # (C2p, LwP) f32
        mean = ssum_ref[...] * inv_count               # (C2p, 1)
        var = ssq_ref[...] * inv_count - mean * mean   # biased (training) var
        inv = jax.lax.rsqrt(var + eps)
        scale = inv * gamma_ref[...]                   # (C2p, 1)
        shift = beta_ref[...] - mean * scale
        o_ref[0] = (y * scale + shift).astype(o_ref.dtype)

    return kernel


# ----------------------------------------------------------------------------
# Wrapper
# ----------------------------------------------------------------------------
@functools.partial(jax.jit, static_argnames=("stride", "padding"))
def conv_bn_forward(x, weight, gamma, beta, stride, padding=None):
    """x: (N, C1, H, W), weight: (C2, C1, K, K), gamma/beta: (C2,)."""
    N, C1, H, W = x.shape
    C2, _, K, _ = weight.shape
    s = stride
    p = (K // 2) if padding is None else padding

    HP, WP = H + 2 * p, W + 2 * p
    OH1 = HP - K + 1                                 # stride-1 output rows
    OH, OW = (HP - K) // s + 1, (WP - K) // s + 1    # strided (PyTorch) grid
    Lw = OH1 * WP                                    # flat stride-1 outputs
    LwP = _round_up(Lw, 128)                         # lane-dense output width
    Lx = _round_up(LwP + (K - 1) * (WP + 1), 128)    # flat input (all windows
                                                     #  in-bounds)
    C2p = _round_up(C2, 8)                           # out-channels -> sublanes
    C1p = _round_up(C1, 8)                           # in-channels  -> sublanes

    # ---- layout prep: pad + flatten only (no im2col, no transpose) ---------
    xp = jnp.pad(x, ((0, 0), (0, C1p - C1), (p, p), (p, p)))
    xflat = xp.reshape(N, C1p, HP * WP)
    xflat = jnp.pad(xflat, ((0, 0), (0, 0), (0, Lx - HP * WP)))
    xflat = xflat.astype(jnp.bfloat16)

    wt = jnp.transpose(weight, (2, 3, 0, 1)).reshape(K * K, C2, C1)
    wt = jnp.pad(wt, ((0, 0), (0, C2p - C2), (0, C1p - C1)))
    wt = wt.astype(jnp.bfloat16)

    gamma_p = jnp.pad(gamma.astype(jnp.float32), (0, C2p - C2)).reshape(C2p, 1)
    beta_p = jnp.pad(beta.astype(jnp.float32), (0, C2p - C2)).reshape(C2p, 1)

    # Validity mask over the padded flat stride-1 grid (selects the strided,
    # non-garbage output columns used for BN statistics).
    r = jnp.arange(OH1)[:, None]
    c = jnp.arange(WP)[None, :]
    valid = (r % s == 0) & (r // s < OH) & (c % s == 0) & (c // s < OW)
    mask = valid.astype(jnp.float32).reshape(1, Lw)
    mask = jnp.pad(mask, ((0, 0), (0, LwP - Lw)))

    inv_count = 1.0 / float(N * OH * OW)

    # ---- pass 1: conv + global stats (grid over batch, sequential) ---------
    flops1 = 2 * N * K * K * C1p * C2p * LwP
    bytes1 = (N * C1p * Lx * 2 + K * K * C2p * C1p * 2 + LwP * 4
              + N * C2p * LwP * 4 + 2 * C2p * 4)
    y_flat, ssum, ssq = pl.pallas_call(
        _make_conv_stats_kernel(K, C2p, WP, LwP),
        out_shape=(
            jax.ShapeDtypeStruct((N, C2p, LwP), jnp.float32),
            jax.ShapeDtypeStruct((C2p, 1), jnp.float32),
            jax.ShapeDtypeStruct((C2p, 1), jnp.float32),
        ),
        grid=(N,),
        in_specs=[
            pl.BlockSpec((1, C1p, Lx), lambda n: (n, 0, 0)),
            pl.BlockSpec((K * K, C2p, C1p), lambda n: (0, 0, 0)),
            pl.BlockSpec((1, LwP), lambda n: (0, 0)),
        ],
        out_specs=(
            pl.BlockSpec((1, C2p, LwP), lambda n: (n, 0, 0)),
            pl.BlockSpec((C2p, 1), lambda n: (0, 0)),
            pl.BlockSpec((C2p, 1), lambda n: (0, 0)),
        ),
        compiler_params=pltpu.CompilerParams(
            dimension_semantics=("arbitrary",),      # stats carried across grid
            vmem_limit_bytes=32 * 1024 * 1024,
        ),
        cost_estimate=pl.CostEstimate(
            flops=flops1, transcendentals=0, bytes_accessed=bytes1),
    )(xflat, wt, mask)

    # ---- pass 2: normalize (independent per batch tile -> parallel) --------
    bytes2 = 2 * N * C2p * LwP * 4 + 4 * C2p * 4
    out_flat = pl.pallas_call(
        _make_bn_apply_kernel(inv_count, BN_EPS),
        out_shape=jax.ShapeDtypeStruct((N, C2p, LwP), jnp.float32),
        grid=(N,),
        in_specs=[
            pl.BlockSpec((1, C2p, LwP), lambda n: (n, 0, 0)),
            pl.BlockSpec((C2p, 1), lambda n: (0, 0)),
            pl.BlockSpec((C2p, 1), lambda n: (0, 0)),
            pl.BlockSpec((C2p, 1), lambda n: (0, 0)),
            pl.BlockSpec((C2p, 1), lambda n: (0, 0)),
        ],
        out_specs=pl.BlockSpec((1, C2p, LwP), lambda n: (n, 0, 0)),
        compiler_params=pltpu.CompilerParams(
            dimension_semantics=("parallel",),       # shards over v7x's 2 TCs
            vmem_limit_bytes=32 * 1024 * 1024,
        ),
        cost_estimate=pl.CostEstimate(
            flops=3 * N * C2p * LwP, transcendentals=C2p,
            bytes_accessed=bytes2),
    )(y_flat, ssum, ssq, gamma_p, beta_p)

    # Output is already channel-major: drop channel/lane padding, split the
    # flat spatial axis and take the strided / non-padded columns.  No
    # NHWC->NCHW transpose needed.
    out = out_flat[:, :C2, :Lw].reshape(N, C2, OH1, WP)
    out = out[:, :, : (OH - 1) * s + 1 : s, : (OW - 1) * s + 1 : s]
    return out


# ----------------------------------------------------------------------------
# Pure-JAX reference (same bf16 operand rounding, f32 accumulation).
# ----------------------------------------------------------------------------
def reference(x, weight, gamma, beta, stride, padding=None):
    K = weight.shape[-1]
    p = (K // 2) if padding is None else padding
    xb = x.astype(jnp.bfloat16).astype(jnp.float32)
    wb = weight.astype(jnp.bfloat16).astype(jnp.float32)
    y = jax.lax.conv_general_dilated(
        xb, wb, (stride, stride), [(p, p), (p, p)],
        dimension_numbers=("NCHW", "OIHW", "NCHW"),
        precision=jax.lax.Precision.HIGHEST)
    mean = jnp.mean(y, axis=(0, 2, 3), keepdims=True)
    var = jnp.mean((y - mean) ** 2, axis=(0, 2, 3), keepdims=True)
    return ((y - mean) * jax.lax.rsqrt(var + BN_EPS)
            * gamma.reshape(1, -1, 1, 1) + beta.reshape(1, -1, 1, 1))


if __name__ == "__main__":
    # Conv_1(c1=4, c2=8, k=3, s=1) on a small input.
    N, C1, H, W = 2, 4, 16, 16
    C2, K, S = 8, 3, 1

    key = jax.random.PRNGKey(0)
    k_x, k_w = jax.random.split(key)
    x = jax.random.normal(k_x, (N, C1, H, W), dtype=jnp.float32)
    weight = 0.1 * jax.random.normal(k_w, (C2, C1, K, K), dtype=jnp.float32)
    # BatchNorm2d default init: weight (gamma) = 1, bias (beta) = 0.
    gamma = jnp.ones((C2,), dtype=jnp.float32)
    beta = jnp.zeros((C2,), dtype=jnp.float32)

    out = conv_bn_forward(x, weight, gamma, beta, S)
    out = jax.block_until_ready(out)

    ref = reference(x, weight, gamma, beta, S)
    assert out.shape == (N, C2, H, W), out.shape
    assert jnp.allclose(out, ref, atol=1e-3, rtol=1e-3), float(
        jnp.max(jnp.abs(out - ref)))

    print("KERNEL_OK")
</pallas_src>

<mosaic_0001>
module attributes {stable_mosaic.version = 11 : i64} {
  func.func @kernel(%arg0: i32, %arg1: memref<1x8x512xbf16, #tpu.memory_space<vmem>>, %arg2: memref<9x8x8xbf16, #tpu.memory_space<vmem>>, %arg3: memref<1x384xf32, #tpu.memory_space<vmem>>, %arg4: memref<1x8x384xf32, #tpu.memory_space<vmem>>, %arg5: memref<8x1xf32, #tpu.memory_space<vmem>>, %arg6: memref<8x1xf32, #tpu.memory_space<vmem>>) attributes {dimension_semantics = [#tpu.dimension_semantics<arbitrary>], iteration_bounds = array<i64: 2>, scalar_prefetch = 0 : i64, scratch_operands = 0 : i64, tpu.core_type = #tpu.core_type<tc>, window_params = [{transform_indices = @transform_0, window_bounds = array<i64: 1, 8, 512>}, {pipeline_mode = #tpu.pipeline_mode<synchronous>, transform_indices = @transform_1, window_bounds = array<i64: 9, 8, 8>}, {pipeline_mode = #tpu.pipeline_mode<synchronous>, transform_indices = @transform_2, window_bounds = array<i64: 1, 384>}, {transform_indices = @transform_3, window_bounds = array<i64: 1, 8, 384>}, {pipeline_mode = #tpu.pipeline_mode<synchronous>, transform_indices = @transform_4, window_bounds = array<i64: 8, 1>}, {pipeline_mode = #tpu.pipeline_mode<synchronous>, transform_indices = @transform_5, window_bounds = array<i64: 8, 1>}]} {
    %c0_i32 = arith.constant 0 : i32
    %0 = arith.cmpi eq, %arg0, %c0_i32 : i32
    %1 = arith.extui %0 : i1 to i32
    %c0_i32_0 = arith.constant 0 : i32
    %2 = arith.cmpi ne, %1, %c0_i32_0 : i32
    scf.if %2 {
      %cst_47 = arith.constant 0.000000e+00 : f32
      %67 = vector.broadcast %cst_47 : f32 to vector<8x1xf32>
      %c0_48 = arith.constant 0 : index
      %c0_49 = arith.constant 0 : index
      %68 = vector.load %arg5[%c0_48, %c0_49] : memref<8x1xf32, #tpu.memory_space<vmem>>, vector<8x1xf32>
      tpu.vector_store %arg5[%c0_48, %c0_49], %67 {strides = array<i32>} : memref<8x1xf32, #tpu.memory_space<vmem>>, vector<8x1xf32>,
      %cst_50 = arith.constant 0.000000e+00 : f32
      %69 = vector.broadcast %cst_50 : f32 to vector<8x1xf32>
      %c0_51 = arith.constant 0 : index
      %c0_52 = arith.constant 0 : index
      %70 = vector.load %arg6[%c0_51, %c0_52] : memref<8x1xf32, #tpu.memory_space<vmem>>, vector<8x1xf32>
      tpu.vector_store %arg6[%c0_51, %c0_52], %69 {strides = array<i32>} : memref<8x1xf32, #tpu.memory_space<vmem>>, vector<8x1xf32>,
    } else {
    }
    %c0 = arith.constant 0 : index
    %c0_1 = arith.constant 0 : index
    %c0_2 = arith.constant 0 : index
    %3 = vector.load %arg1[%c0, %c0_1, %c0_2] : memref<1x8x512xbf16, #tpu.memory_space<vmem>>, vector<1x8x512xbf16>
    %4 = vector.shape_cast %3 : vector<1x8x512xbf16> to vector<8x512xbf16>
    %cst = arith.constant 0.000000e+00 : f32
    %5 = vector.broadcast %cst : f32 to vector<8x384xf32>
    %6 = vector.extract_strided_slice %4 {offsets = [0, 0], sizes = [8, 384], strides = [1, 1]} : vector<8x512xbf16> to vector<8x384xbf16>
    %c0_3 = arith.constant 0 : index
    %c0_4 = arith.constant 0 : index
    %c0_5 = arith.constant 0 : index
    %7 = vector.load %arg2[%c0_3, %c0_4, %c0_5] : memref<9x8x8xbf16, #tpu.memory_space<vmem>>, vector<1x8x8xbf16>
    %8 = vector.shape_cast %7 : vector<1x8x8xbf16> to vector<8x8xbf16>
    %cst_6 = arith.constant dense<0.000000e+00> : vector<8x384xf32>
    %9 = tpu.matmul %8, %6, %cst_6 {dimension_numbers = #tpu.dot_dimension_numbers<[1], [0], [0], [1], [0, 0, 1, 1], [], []>} : vector<8x8xbf16>, vector<8x384xbf16>, vector<8x384xf32> -> vector<8x384xf32>
    %10 = arith.addf %5, %9 : vector<8x384xf32>
    %11 = vector.extract_strided_slice %4 {offsets = [0, 1], sizes = [8, 384], strides = [1, 1]} : vector<8x512xbf16> to vector<8x384xbf16>
    %c1 = arith.constant 1 : index
    %c0_7 = arith.constant 0 : index
    %c0_8 = arith.constant 0 : index
    %12 = vector.load %arg2[%c1, %c0_7, %c0_8] : memref<9x8x8xbf16, #tpu.memory_space<vmem>>, vector<1x8x8xbf16>
    %13 = vector.shape_cast %12 : vector<1x8x8xbf16> to vector<8x8xbf16>
    %cst_9 = arith.constant dense<0.000000e+00> : vector<8x384xf32>
    %14 = tpu.matmul %13, %11, %cst_9 {dimension_numbers = #tpu.dot_dimension_numbers<[1], [0], [0], [1], [0, 0, 1, 1], [], []>} : vector<8x8xbf16>, vector<8x384xbf16>, vector<8x384xf32> -> vector<8x384xf32>
    %15 = arith.addf %10, %14 : vector<8x384xf32>
    %16 = vector.extract_strided_slice %4 {offsets = [0, 2], sizes = [8, 384], strides = [1, 1]} : vector<8x512xbf16> to vector<8x384xbf16>
    %c2 = arith.constant 2 : index
    %c0_10 = arith.constant 0 : index
    %c0_11 = arith.constant 0 : index
    %17 = vector.load %arg2[%c2, %c0_10, %c0_11] : memref<9x8x8xbf16, #tpu.memory_space<vmem>>, vector<1x8x8xbf16>
    %18 = vector.shape_cast %17 : vector<1x8x8xbf16> to vector<8x8xbf16>
    %cst_12 = arith.constant dense<0.000000e+00> : vector<8x384xf32>
    %19 = tpu.matmul %18, %16, %cst_12 {dimension_numbers = #tpu.dot_dimension_numbers<[1], [0], [0], [1], [0, 0, 1, 1], [], []>} : vector<8x8xbf16>, vector<8x384xbf16>, vector<8x384xf32> -> vector<8x384xf32>
    %20 = arith.addf %15, %19 : vector<8x384xf32>
    %21 = vector.extract_strided_slice %4 {offsets = [0, 18], sizes = [8, 384], strides = [1, 1]} : vector<8x512xbf16> to vector<8x384xbf16>
    %c3 = arith.constant 3 : index
    %c0_13 = arith.constant 0 : index
    %c0_14 = arith.constant 0 : index
    %22 = vector.load %arg2[%c3, %c0_13, %c0_14] : memref<9x8x8xbf16, #tpu.memory_space<vmem>>, vector<1x8x8xbf16>
    %23 = vector.shape_cast %22 : vector<1x8x8xbf16> to vector<8x8xbf16>
    %cst_15 = arith.constant dense<0.000000e+00> : vector<8x384xf32>
    %24 = tpu.matmul %23, %21, %cst_15 {dimension_numbers = #tpu.dot_dimension_numbers<[1], [0], [0], [1], [0, 0, 1, 1], [], []>} : vector<8x8xbf16>, vector<8x384xbf16>, vector<8x384xf32> -> vector<8x384xf32>
    %25 = arith.addf %20, %24 : vector<8x384xf32>
    %26 = vector.extract_strided_slice %4 {offsets = [0, 19], sizes = [8, 384], strides = [1, 1]} : vector<8x512xbf16> to vector<8x384xbf16>
    %c4 = arith.constant 4 : index
    %c0_16 = arith.constant 0 : index
    %c0_17 = arith.constant 0 : index
    %27 = vector.load %arg2[%c4, %c0_16, %c0_17] : memref<9x8x8xbf16, #tpu.memory_space<vmem>>, vector<1x8x8xbf16>
    %28 = vector.shape_cast %27 : vector<1x8x8xbf16> to vector<8x8xbf16>
    %cst_18 = arith.constant dense<0.000000e+00> : vector<8x384xf32>
    %29 = tpu.matmul %28, %26, %cst_18 {dimension_numbers = #tpu.dot_dimension_numbers<[1], [0], [0], [1], [0, 0, 1, 1], [], []>} : vector<8x8xbf16>, vector<8x384xbf16>, vector<8x384xf32> -> vector<8x384xf32>
    %30 = arith.addf %25, %29 : vector<8x384xf32>
    %31 = vector.extract_strided_slice %4 {offsets = [0, 20], sizes = [8, 384], strides = [1, 1]} : vector<8x512xbf16> to vector<8x384xbf16>
    %c5 = arith.constant 5 : index
    %c0_19 = arith.constant 0 : index
    %c0_20 = arith.constant 0 : index
    %32 = vector.load %arg2[%c5, %c0_19, %c0_20] : memref<9x8x8xbf16, #tpu.memory_space<vmem>>, vector<1x8x8xbf16>
    %33 = vector.shape_cast %32 : vector<1x8x8xbf16> to vector<8x8xbf16>
    %cst_21 = arith.constant dense<0.000000e+00> : vector<8x384xf32>
    %34 = tpu.matmul %33, %31, %cst_21 {dimension_numbers = #tpu.dot_dimension_numbers<[1], [0], [0], [1], [0, 0, 1, 1], [], []>} : vector<8x8xbf16>, vector<8x384xbf16>, vector<8x384xf32> -> vector<8x384xf32>
    %35 = arith.addf %30, %34 : vector<8x384xf32>
    %36 = vector.extract_strided_slice %4 {offsets = [0, 36], sizes = [8, 384], strides = [1, 1]} : vector<8x512xbf16> to vector<8x384xbf16>
    %c6 = arith.constant 6 : index
    %c0_22 = arith.constant 0 : index
    %c0_23 = arith.constant 0 : index
    %37 = vector.load %arg2[%c6, %c0_22, %c0_23] : memref<9x8x8xbf16, #tpu.memory_space<vmem>>, vector<1x8x8xbf16>
    %38 = vector.shape_cast %37 : vector<1x8x8xbf16> to vector<8x8xbf16>
    %cst_24 = arith.constant dense<0.000000e+00> : vector<8x384xf32>
    %39 = tpu.matmul %38, %36, %cst_24 {dimension_numbers = #tpu.dot_dimension_numbers<[1], [0], [0], [1], [0, 0, 1, 1], [], []>} : vector<8x8xbf16>, vector<8x384xbf16>, vector<8x384xf32> -> vector<8x384xf32>
    %40 = arith.addf %35, %39 : vector<8x384xf32>
    %41 = vector.extract_strided_slice %4 {offsets = [0, 37], sizes = [8, 384], strides = [1, 1]} : vector<8x512xbf16> to vector<8x384xbf16>
    %c7 = arith.constant 7 : index
    %c0_25 = arith.constant 0 : index
    %c0_26 = arith.constant 0 : index
    %42 = vector.load %arg2[%c7, %c0_25, %c0_26] : memref<9x8x8xbf16, #tpu.memory_space<vmem>>, vector<1x8x8xbf16>
    %43 = vector.shape_cast %42 : vector<1x8x8xbf16> to vector<8x8xbf16>
    %cst_27 = arith.constant dense<0.000000e+00> : vector<8x384xf32>
    %44 = tpu.matmul %43, %41, %cst_27 {dimension_numbers = #tpu.dot_dimension_numbers<[1], [0], [0], [1], [0, 0, 1, 1], [], []>} : vector<8x8xbf16>, vector<8x384xbf16>, vector<8x384xf32> -> vector<8x384xf32>
    %45 = arith.addf %40, %44 : vector<8x384xf32>
    %46 = vector.extract_strided_slice %4 {offsets = [0, 38], sizes = [8, 384], strides = [1, 1]} : vector<8x512xbf16> to vector<8x384xbf16>
    %c8 = arith.constant 8 : index
    %c0_28 = arith.constant 0 : index
    %c0_29 = arith.constant 0 : index
    %47 = vector.load %arg2[%c8, %c0_28, %c0_29] : memref<9x8x8xbf16, #tpu.memory_space<vmem>>, vector<1x8x8xbf16>
    %48 = vector.shape_cast %47 : vector<1x8x8xbf16> to vector<8x8xbf16>
    %cst_30 = arith.constant dense<0.000000e+00> : vector<8x384xf32>
    %49 = tpu.matmul %48, %46, %cst_30 {dimension_numbers = #tpu.dot_dimension_numbers<[1], [0], [0], [1], [0, 0, 1, 1], [], []>} : vector<8x8xbf16>, vector<8x384xbf16>, vector<8x384xf32> -> vector<8x384xf32>
    %50 = arith.addf %45, %49 : vector<8x384xf32>
    %c0_31 = arith.constant 0 : index
    %c0_32 = arith.constant 0 : index
    %51 = vector.load %arg3[%c0_31, %c0_32] : memref<1x384xf32, #tpu.memory_space<vmem>>, vector<1x384xf32>
    %52 = vector.broadcast %51 : vector<1x384xf32> to vector<8x384xf32>
    %53 = arith.mulf %50, %52 : vector<8x384xf32>
    %c0_33 = arith.constant 0 : index
    %c0_34 = arith.constant 0 : index
    %c0_35 = arith.constant 0 : index
    %54 = vector.load %arg4[%c0_33, %c0_34, %c0_35] : memref<1x8x384xf32, #tpu.memory_space<vmem>>, vector<1x8x384xf32>
    %55 = vector.shape_cast %54 : vector<1x8x384xf32> to vector<8x384xf32>
    %56 = vector.shape_cast %53 : vector<8x384xf32> to vector<1x8x384xf32>
    tpu.vector_store %arg4[%c0_33, %c0_34, %c0_35], %56 {strides = array<i32>} : memref<1x8x384xf32, #tpu.memory_space<vmem>>, vector<1x8x384xf32>,
    %cst_36 = arith.constant 1.000000e+00 : f32
    %57 = vector.broadcast %cst_36 : f32 to vector<384x1xf32>
    %c0_37 = arith.constant 0 : index
    %c0_38 = arith.constant 0 : index
    %58 = vector.load %arg5[%c0_37, %c0_38] : memref<8x1xf32, #tpu.memory_space<vmem>>, vector<8x1xf32>
    %cst_39 = arith.constant dense<0.000000e+00> : vector<8x1xf32>
    %59 = tpu.matmul %53, %57, %cst_39 {dimension_numbers = #tpu.dot_dimension_numbers<[1], [0], [0], [1], [0, 0, 1, 1], [], []>} : vector<8x384xf32>, vector<384x1xf32>, vector<8x1xf32> -> vector<8x1xf32>
    %60 = arith.addf %58, %59 : vector<8x1xf32>
    %c0_40 = arith.constant 0 : index
    %c0_41 = arith.constant 0 : index
    %61 = vector.load %arg5[%c0_40, %c0_41] : memref<8x1xf32, #tpu.memory_space<vmem>>, vector<8x1xf32>
    tpu.vector_store %arg5[%c0_40, %c0_41], %60 {strides = array<i32>} : memref<8x1xf32, #tpu.memory_space<vmem>>, vector<8x1xf32>,
    %c0_42 = arith.constant 0 : index
    %c0_43 = arith.constant 0 : index
    %62 = vector.load %arg6[%c0_42, %c0_43] : memref<8x1xf32, #tpu.memory_space<vmem>>, vector<8x1xf32>
    %63 = arith.mulf %53, %53 : vector<8x384xf32>
    %cst_44 = arith.constant dense<0.000000e+00> : vector<8x1xf32>
    %64 = tpu.matmul %63, %57, %cst_44 {dimension_numbers = #tpu.dot_dimension_numbers<[1], [0], [0], [1], [0, 0, 1, 1], [], []>} : vector<8x384xf32>, vector<384x1xf32>, vector<8x1xf32> -> vector<8x1xf32>
    %65 = arith.addf %62, %64 : vector<8x1xf32>
    %c0_45 = arith.constant 0 : index
    %c0_46 = arith.constant 0 : index
    %66 = vector.load %arg6[%c0_45, %c0_46] : memref<8x1xf32, #tpu.memory_space<vmem>>, vector<8x1xf32>
    tpu.vector_store %arg6[%c0_45, %c0_46], %65 {strides = array<i32>} : memref<8x1xf32, #tpu.memory_space<vmem>>, vector<8x1xf32>,
    return
  }
  func.func @transform_0(%arg0: i32) -> (i32, i32, i32) {
    %c0_i32 = arith.constant 0 : i32
    %c0_i32_0 = arith.constant 0 : i32
    %c0_i32_1 = arith.constant 0 : i32
    return %arg0, %c0_i32, %c0_i32_0 : i32, i32, i32
  }
  func.func @transform_1(%arg0: i32) -> (i32, i32, i32) {
    %c0_i32 = arith.constant 0 : i32
    %c0_i32_0 = arith.constant 0 : i32
    %c0_i32_1 = arith.constant 0 : i32
    %c0_i32_2 = arith.constant 0 : i32
    return %c0_i32, %c0_i32_0, %c0_i32_1 : i32, i32, i32
  }
  func.func @transform_2(%arg0: i32) -> (i32, i32) {
    %c0_i32 = arith.constant 0 : i32
    %c0_i32_0 = arith.constant 0 : i32
    %c0_i32_1 = arith.constant 0 : i32
    return %c0_i32, %c0_i32_0 : i32, i32
  }
  func.func @transform_3(%arg0: i32) -> (i32, i32, i32) {
    %c0_i32 = arith.constant 0 : i32
    %c0_i32_0 = arith.constant 0 : i32
    %c0_i32_1 = arith.constant 0 : i32
    return %arg0, %c0_i32, %c0_i32_0 : i32, i32, i32
  }
  func.func @transform_4(%arg0: i32) -> (i32, i32) {
    %c0_i32 = arith.constant 0 : i32
    %c0_i32_0 = arith.constant 0 : i32
    %c0_i32_1 = arith.constant 0 : i32
    return %c0_i32, %c0_i32_0 : i32, i32
  }
  func.func @transform_5(%arg0: i32) -> (i32, i32) {
    %c0_i32 = arith.constant 0 : i32
    %c0_i32_0 = arith.constant 0 : i32
    %c0_i32_1 = arith.constant 0 : i32
    return %c0_i32, %c0_i32_0 : i32, i32
  }
}

module attributes {stable_mosaic.version = 11 : i64} {
  func.func @kernel(%arg0: i32, %arg1: memref<1x8x384xf32, #tpu.memory_space<vmem>>, %arg2: memref<8x1xf32, #tpu.memory_space<vmem>>, %arg3: memref<8x1xf32, #tpu.memory_space<vmem>>, %arg4: memref<8x1xf32, #tpu.memory_space<vmem>>, %arg5: memref<8x1xf32, #tpu.memory_space<vmem>>, %arg6: memref<1x8x384xf32, #tpu.memory_space<vmem>>) attributes {dimension_semantics = [#tpu.dimension_semantics<parallel>], iteration_bounds = array<i64: 2>, scalar_prefetch = 0 : i64, scratch_operands = 0 : i64, tpu.core_type = #tpu.core_type<tc>, window_params = [{transform_indices = @transform_0, window_bounds = array<i64: 1, 8, 384>}, {pipeline_mode = #tpu.pipeline_mode<synchronous>, transform_indices = @transform_1, window_bounds = array<i64: 8, 1>}, {pipeline_mode = #tpu.pipeline_mode<synchronous>, transform_indices = @transform_2, window_bounds = array<i64: 8, 1>}, {pipeline_mode = #tpu.pipeline_mode<synchronous>, transform_indices = @transform_3, window_bounds = array<i64: 8, 1>}, {pipeline_mode = #tpu.pipeline_mode<synchronous>, transform_indices = @transform_4, window_bounds = array<i64: 8, 1>}, {transform_indices = @transform_5, window_bounds = array<i64: 1, 8, 384>}]} {
    %c0 = arith.constant 0 : index
    %c0_0 = arith.constant 0 : index
    %c0_1 = arith.constant 0 : index
    %0 = vector.load %arg1[%c0, %c0_0, %c0_1] : memref<1x8x384xf32, #tpu.memory_space<vmem>>, vector<1x8x384xf32>
    %1 = vector.shape_cast %0 : vector<1x8x384xf32> to vector<8x384xf32>
    %c0_2 = arith.constant 0 : index
    %c0_3 = arith.constant 0 : index
    %2 = vector.load %arg2[%c0_2, %c0_3] : memref<8x1xf32, #tpu.memory_space<vmem>>, vector<8x1xf32>
    %cst = arith.constant 0.001953125 : f32
    %3 = vector.broadcast %cst : f32 to vector<8x1xf32>
    %4 = arith.mulf %2, %3 : vector<8x1xf32>
    %c0_4 = arith.constant 0 : index
    %c0_5 = arith.constant 0 : index
    %5 = vector.load %arg3[%c0_4, %c0_5] : memref<8x1xf32, #tpu.memory_space<vmem>>, vector<8x1xf32>
    %cst_6 = arith.constant 0.001953125 : f32
    %6 = vector.broadcast %cst_6 : f32 to vector<8x1xf32>
    %7 = arith.mulf %5, %6 : vector<8x1xf32>
    %8 = arith.mulf %4, %4 : vector<8x1xf32>
    %9 = arith.subf %7, %8 : vector<8x1xf32>
    %cst_7 = arith.constant 9.99999974E-6 : f32
    %10 = vector.broadcast %cst_7 : f32 to vector<8x1xf32>
    %11 = arith.addf %9, %10 : vector<8x1xf32>
    %12 = math.rsqrt %11 : vector<8x1xf32>
    %c0_8 = arith.constant 0 : index
    %c0_9 = arith.constant 0 : index
    %13 = vector.load %arg4[%c0_8, %c0_9] : memref<8x1xf32, #tpu.memory_space<vmem>>, vector<8x1xf32>
    %14 = arith.mulf %12, %13 : vector<8x1xf32>
    %c0_10 = arith.constant 0 : index
    %c0_11 = arith.constant 0 : index
    %15 = vector.load %arg5[%c0_10, %c0_11] : memref<8x1xf32, #tpu.memory_space<vmem>>, vector<8x1xf32>
    %16 = arith.mulf %4, %14 : vector<8x1xf32>
    %17 = arith.subf %15, %16 : vector<8x1xf32>
    %18 = vector.broadcast %14 : vector<8x1xf32> to vector<8x384xf32>
    %19 = arith.mulf %1, %18 : vector<8x384xf32>
    %20 = vector.broadcast %17 : vector<8x1xf32> to vector<8x384xf32>
    %21 = arith.addf %19, %20 : vector<8x384xf32>
    %c0_12 = arith.constant 0 : index
    %c0_13 = arith.constant 0 : index
    %c0_14 = arith.constant 0 : index
    %22 = vector.load %arg6[%c0_12, %c0_13, %c0_14] : memref<1x8x384xf32, #tpu.memory_space<vmem>>, vector<1x8x384xf32>
    %23 = vector.shape_cast %22 : vector<1x8x384xf32> to vector<8x384xf32>
    %24 = vector.shape_cast %21 : vector<8x384xf32> to vector<1x8x384xf32>
    tpu.vector_store %arg6[%c0_12, %c0_13, %c0_14], %24 {strides = array<i32>} : memref<1x8x384xf32, #tpu.memory_space<vmem>>, vector<1x8x384xf32>,
    return
  }
  func.func @transform_0(%arg0: i32) -> (i32, i32, i32) {
    %c0_i32 = arith.constant 0 : i32
    %c0_i32_0 = arith.constant 0 : i32
    %c0_i32_1 = arith.constant 0 : i32
    return %arg0, %c0_i32, %c0_i32_0 : i32, i32, i32
  }
  func.func @transform_1(%arg0: i32) -> (i32, i32) {
    %c0_i32 = arith.constant 0 : i32
    %c0_i32_0 = arith.constant 0 : i32
    %c0_i32_1 = arith.constant 0 : i32
    return %c0_i32, %c0_i32_0 : i32, i32
  }
  func.func @transform_2(%arg0: i32) -> (i32, i32) {
    %c0_i32 = arith.constant 0 : i32
    %c0_i32_0 = arith.constant 0 : i32
    %c0_i32_1 = arith.constant 0 : i32
    return %c0_i32, %c0_i32_0 : i32, i32
  }
  func.func @transform_3(%arg0: i32) -> (i32, i32) {
    %c0_i32 = arith.constant 0 : i32
    %c0_i32_0 = arith.constant 0 : i32
    %c0_i32_1 = arith.constant 0 : i32
    return %c0_i32, %c0_i32_0 : i32, i32
  }
  func.func @transform_4(%arg0: i32) -> (i32, i32) {
    %c0_i32 = arith.constant 0 : i32
    %c0_i32_0 = arith.constant 0 : i32
    %c0_i32_1 = arith.constant 0 : i32
    return %c0_i32, %c0_i32_0 : i32, i32
  }
  func.func @transform_5(%arg0: i32) -> (i32, i32, i32) {
    %c0_i32 = arith.constant 0 : i32
    %c0_i32_0 = arith.constant 0 : i32
    %c0_i32_1 = arith.constant 0 : i32
    return %arg0, %c0_i32, %c0_i32_0 : i32, i32, i32
  }
}

</mosaic_0001>

<bundles_post_ra>
// kernel: conv_bn_forward.3
= control target key start
LH: loop header
LB: loop body
LE: loop exit
PB: predicated region body
PF: predicated region fallthrough
CT: control target
= control target key end

     0   :  { %s385_s18 = smov 0   ;;  %s418_s0 = inlined_call_operand.vmem [shape: f32[2,8,384], index: 0, kind: input, shape index: {}]   ;;  %s419_s1 = inlined_call_operand.vmem [shape: f32[8,1], index: 1, kind: input, shape index: {}]   ;;  %s420_s2 = inlined_call_operand.vmem [shape: f32[8,1], index: 2, kind: input, shape index: {}]   ;;  %s421_s3 = inlined_call_operand.vmem [shape: f32[8,1], index: 3, kind: input, shape index: {}]   ;;  %s422_s4 = inlined_call_operand.vmem [shape: f32[8,1], index: 4, kind: input, shape index: {}]   ;;  %s423_s5 = inlined_call_operand.vmem [shape: f32[2,8,384], index: 5, kind: output, shape index: {}]  }
   0x1 LB: > { %s324_s19 = sadd.s32 4294967295, %s352_s18   ;;  %p328_p0 = scmp.ge.s32.totalorder %s352_s18, 1  ;;  %s352_s18 = sphi %s385_s18, %s15_s18  }
   0x2   : > { %p187_p1 = scmp.lt.s32.totalorder %s352_s18, 3 }
   0x4   : > { %p188_p2 = pnand %p328_p0, %p187_p1 }
   0x5   : > { %p215_p3 = scmp.lt.s32.totalorder (!%p188_p2), %s324_s19, 1 }
   0x6   : > { %191 = sbr.rel (%p188_p2) target bundleno = 168 (0xa8), region = 40 }
   0xb   : > { %v228_v0 = vld [vmem:[%s419_s1] sm:$0xff]  ;;  %v354_v2 = vmov 0   ;;  %s425_s19 = smov (!%p215_p3, %s324_s19), 1 }
   0xc   : > { %v230_v1 = vld [vmem:[%s420_s2] sm:$0xff]  ;;  %343 = vset.pattern.permute.xlu0 %v354_v2  ;;  %v229_v3 = vmul.f32 0.001953125, %v228_v0  ;;  %s333_s28 = smul.u32 24, %s425_s19 }
   0xd   : > { %v231_v4 = vmul.f32 0.001953125, %v230_v1  ;;  %v245_v14 = vld [vmem:[%s421_s3] sm:$0xff] }
   0xe   : > { %v232_v5 = vmul.f32 %v229_v3, %v229_v3  ;;  %v247_v18 = vld [vmem:[%s422_s4] sm:$0xff]  ;;  %s219_s6 = scalar_lea.vmem %s418_s0, %s333_s28  ;;  %s224_s9 = scalar_lea.vmem %s423_s5, %s333_s28 }
   0xf   : > { %v225_v21 = vld [vmem:[%s219_s6] sm:$0xff]  ;;  %v226_v22 = vld [vmem:[%s219_s6 + $0x8] sm:$0xff]  ;;  %v227_v23 = vld [vmem:[%s219_s6 + $0x10] sm:$0xff] }
  0x10   : > { %v233_v6 = vsub.f32 %v231_v4, %v232_v5 }
  0x12   : > { %v234_v7 = vadd.f32 1e-05, %v233_v6 }
  0x14   : > { %344 = vrsqrt.f32 %v234_v7  ;;  %vm241_vm0 = vweird.f32 %v234_v7 }
  0x1a   : > { %v345_v8 = vpop.eup %344 }
  0x1b   : > { %v236_v9 = vmul.f32 %v345_v8, %v234_v7  ;;  %vm242_vm1 = vweird.f32 %v345_v8 }
  0x1c   : > { %vm243_vm2 = vmor %vm241_vm0, %vm242_vm1 }
  0x1d   : > { %v237_v10 = vmul.f32 %v345_v8, %v236_v9 }
  0x1f   : > { %v238_v11 = vmul.f32 0.5, %v237_v10 }
  0x21   : > { %v239_v12 = vsub.f32 1.5, %v238_v11 }
  0x23   : > { %v240_v13 = vmul.f32 %v345_v8, %v239_v12 }
  0x25   : > { %v244_v15 = vsel %vm243_vm2, %v345_v8, %v240_v13 }
  0x26   : > { %v246_v16 = vmul.f32 %v245_v14, %v244_v15 }
  0x28   : > { %252 = vperm.xlu0 %343, %v246_v16   ;;  %v248_v17 = vmul.f32 %v246_v16, %v229_v3 }
  0x2a   : > { %v249_v19 = vsub.f32 %v247_v18, %v248_v17 }
  0x30   : > { %260 = vperm.xlu0 %343, %v249_v19  }
  0x9a   : > { %v253_v20 = vpop.permute.xlu0 %252 }
  0x9b   : > { %v255_v24 = vmul.f32 %v253_v20, %v225_v21  ;;  %v256_v25 = vmul.f32 %v253_v20, %v226_v22  ;;  %v257_v26 = vmul.f32 %v253_v20, %v227_v23 }
  0xa2   : > { %v261_v27 = vpop.permute.xlu0 %260 }
  0xa3   : > { %v263_v28 = vadd.f32 %v261_v27, %v255_v24  ;;  %v264_v29 = vadd.f32 %v261_v27, %v256_v25  ;;  %v265_v30 = vadd.f32 %v261_v27, %v257_v26 }
  0xa5   : > { %266 = vst [vmem:[%s224_s9] sm:$0xff] %v263_v28 }
  0xa6   : > { %267 = vst [vmem:[%s224_s9 + $0x8] sm:$0xff] %v264_v29 }
  0xa7   : > { %268 = vst [vmem:[%s224_s9 + $0x10] sm:$0xff] %v265_v30 }
  0xa8 PF: > { %s15_s18 = sadd.s32 1, %s352_s18  }
  0xa9   : > { %p12_p4 = scmp.ge.s32.totalorder %s15_s18, 4  }
  0xab   :  { %14 = sbr.rel (!%p12_p4) target bundleno = 1 (0x1), region = 70 }

// kernel: conv_bn_forward.2
= control target key start
LH: loop header
LB: loop body
LE: loop exit
PB: predicated region body
PF: predicated region fallthrough
CT: control target
= control target key end

     0   :  { %s1160_s18 = smov 0   ;;  %s1440_s0 = inlined_call_operand.vmem [shape: bf16[2,8,512], index: 0, kind: input, shape index: {}]   ;;  %s1441_s1 = inlined_call_operand.vmem [shape: bf16[9,8,8], index: 1, kind: input, shape index: {}]   ;;  %s1442_s2 = inlined_call_operand.vmem [shape: f32[1,384], index: 2, kind: input, shape index: {}]   ;;  %s1443_s3 = inlined_call_operand.vmem [shape: f32[2,8,384], index: 3, kind: output, shape index: {0}]   ;;  %s1444_s4 = inlined_call_operand.vmem [shape: f32[8,1], index: 4, kind: output, shape index: {1}]   ;;  %s1445_s5 = inlined_call_operand.vmem [shape: f32[8,1], index: 5, kind: output, shape index: {2}]  }
   0x1 LB: > { %s1046_s19 = sadd.s32 4294967295, %s1118_s18   ;;  %p1050_p0 = scmp.ge.s32.totalorder %s1118_s18, 1  ;;  %s1118_s18 = sphi %s1160_s18, %s16_s18  }
   0x2   : > { %p182_p1 = scmp.lt.s32.totalorder %s1118_s18, 3 }
   0x4   : > { %p183_p2 = pnand %p1050_p0, %p182_p1 }
   0x5   : > { %p210_p3 = scmp.lt.s32.totalorder (!%p183_p2), %s1046_s19, 1  ;;  %p1054_p4 = scmp.ne.s32.totalorder (!%p183_p2), %s1046_s19, 0 }
   0x6   : > { %186 = sbr.rel (%p183_p2) target bundleno = 536 (0x218), region = 32 }
   0xb   : > { %s211_s20 = scalar_select %p210_p3, %s1046_s19, 1 }
   0xc   : > { %224 = sbr.rel (%p1054_p4) target bundleno = 20 (0x14), region = 36 }
   0xd   : > { %s1092_s21 = sshll.u32 %s211_s20, 4  ;;  %s1093_s22 = smul.u32 24, %s211_s20 }
   0xe   : > { %s214_s25 = scalar_lea.vmem %s1440_s0, %s1092_s21 }
   0xf   : > { %s1174_s28 = scalar_lea.vmem %s1443_s3, %s1093_s22 }
  0x11   : > { %vm225_vm0 = vcmask 7168   ;;  %v1120_v0 = vmov 0.0  }
  0x12   : > { %226 = vst.msk [vmem:[%s1444_s4] sm:$0xff] %vm225_vm0, %v1120_v0 }
  0x13   : > { %227 = vst.msk [vmem:[%s1445_s5] sm:$0xff] %vm225_vm0, %v1120_v0 }
  0x14 PF: > { %v229_v1 = vld [vmem:[%s214_s25 + $0x8] sm:$0xff]  ;;  %v228_v2 = vld [vmem:[%s214_s25] sm:$0xff]  ;;  %s1121_s8 = smov 127   ;;  %s1122_s9 = smov 126   ;;  %vm259_vm1 = vcmask 1043456   ;;  %vm255_vm2 = vcmask 64512  }
  0x15   : > { %v237_v3 = vunpack.c.l.b16 %v229_v1  ;;  %v235_v4 = vunpack.c.l.b16 %v228_v2  ;;  %v238_v7 = vunpack.c.h.b16 %v229_v1  ;;  %v236_v8 = vunpack.c.h.b16 %v228_v2  ;;  %s1123_s10 = smov 110   ;;  %s1124_s11 = smov 109   ;;  %v1196_v12 = vld [vmem:[%s1441_s1] sm:$0xf]  ;;  %v1055_v30 = vld [vmem:[%s1441_s1 + $0x4] sm:$0xf] }
  0x16   : > { %s1125_s12 = smov 108   ;;  %s1126_s13 = smov 92   ;;  %vm369_vm3 = vcmask 1031168   ;;  %vm251_vm4 = vcmask 1039360   ;;  %v1062_v39 = vld [vmem:[%s1441_s1 + $0x8] sm:$0xf] }
  0x17   : > { %v1182_v5 = vpack.c.b16 %v237_v3, %v237_v3  ;;  %v239_v6 = vpack.c.b16 %v235_v4, %v235_v4  ;;  %v242_v9 = vpack.c.b16 %v238_v7, %v238_v7  ;;  %v240_v10 = vpack.c.b16 %v236_v8, %v236_v8  ;;  %s1127_s14 = smov 91   ;;  %s1128_s15 = smov 90   ;;  %v1066_v54 = vld [vmem:[%s1441_s1 + $0xc] sm:$0xf]  ;;  %v1237_v55 = vld [vmem:[%s1441_s1 + $0x10] sm:$0xf] }
  0x18   : > { %vm437_vm5 = vcmask 900096   ;;  %vm505_vm6 = vcmask 891904   ;;  %vm573_vm7 = vcmask 883712   ;;  %vm709_vm8 = vcmask 744448  }
  0x19   : > { %247 = vrot.lane.b32.xlu1 %v1182_v5, %s1121_s8  ;;  %243 = vrot.lane.b32.xlu0 %v239_v6, %s1121_s8  ;;  %v312_v11 = vsel %vm259_vm1, %v239_v6, 0  ;;  %v315_v15 = vsel %vm259_vm1, %v240_v10, 0  ;;  %v318_v31 = vsel %vm259_vm1, %v1182_v5, 0  ;;  %vm641_vm9 = vcmask 752640  }
  0x1a   : > { %361 = vrot.lane.b32.xlu2 %v239_v6, %s1122_s9  ;;  %327 = vmatpush.bf16.msra.mxu3 %v312_v11  ;;  %vm777_vm10 = vcmask 736256   ;;  %vm911_vm11 = vcmask 7168  }
  0x1b   : > { %340 = vmatpush.bf16.msra.mxu0 %v315_v15 }
  0x1d   : > { %1059 = vmatmul.msk.bf16.vlgmr.msra.gmra.mxu3 %vm255_vm2, %v1196_v12 }
  0x1e   : > { %1060 = vmatmul.msk.bf16.vlgmr.msra.gmra.mxu0 %vm255_vm2, %v1196_v12 }
  0x21   : > { %249 = vrot.lane.b32.xlu1 %v242_v9, %s1121_s8  ;;  %245 = vrot.lane.b32.xlu0 %v240_v10, %s1121_s8 }
  0x22   : > { %363 = vrot.lane.b32.xlu2 %v240_v10, %s1122_s9 }
  0x29   : > { %365 = vrot.lane.b32.xlu0 %v1182_v5, %s1122_s9  ;;  %367 = vrot.lane.b32.xlu1 %v242_v9, %s1122_s9 }
  0x2a   : > { %429 = vrot.lane.b32.xlu2 %v239_v6, %s1123_s10 }
  0x31   : > { %433 = vrot.lane.b32.xlu1 %v1182_v5, %s1123_s10  ;;  %431 = vrot.lane.b32.xlu0 %v240_v10, %s1123_s10 }
  0x32   : > { %497 = vrot.lane.b32.xlu2 %v239_v6, %s1124_s11 }
  0x39   : > { %435 = vrot.lane.b32.xlu1 %v242_v9, %s1123_s10  ;;  %499 = vrot.lane.b32.xlu0 %v240_v10, %s1124_s11 }
  0x3a   : > { %501 = vrot.lane.b32.xlu2 %v1182_v5, %s1124_s11 }
  0x41   : > { %503 = vrot.lane.b32.xlu0 %v242_v9, %s1124_s11  ;;  %567 = vrot.lane.b32.xlu1 %v240_v10, %s1125_s12 }
  0x42   : > { %569 = vrot.lane.b32.xlu2 %v1182_v5, %s1125_s12 }
  0x49   : > { %565 = vrot.lane.b32.xlu0 %v239_v6, %s1125_s12  ;;  %571 = vrot.lane.b32.xlu1 %v242_v9, %s1125_s12 }
  0x4a   : > { %633 = vrot.lane.b32.xlu2 %v239_v6, %s1126_s13 }
  0x51   : > { %637 = vrot.lane.b32.xlu1 %v1182_v5, %s1126_s13  ;;  %635 = vrot.lane.b32.xlu0 %v240_v10, %s1126_s13 }
  0x52   : > { %639 = vrot.lane.b32.xlu2 %v242_v9, %s1126_s13 }
  0x59   : > { %701 = vrot.lane.b32.xlu0 %v239_v6, %s1127_s14  ;;  %703 = vrot.lane.b32.xlu1 %v240_v10, %s1127_s14 }
  0x5a   : > { %705 = vrot.lane.b32.xlu2 %v1182_v5, %s1127_s14 }
  0x61   : > { %769 = vrot.lane.b32.xlu0 %v239_v6, %s1128_s15  ;;  %771 = vrot.lane.b32.xlu1 %v240_v10, %s1128_s15  ;;  %v1074_v6 = vld [vmem:[%s1441_s1 + $0x14] sm:$0xf] }
  0x62   : > { %707 = vrot.lane.b32.xlu2 %v242_v9, %s1127_s14 }
  0x69   : > { %773 = vrot.lane.b32.xlu0 %v1182_v5, %s1128_s15  ;;  %775 = vrot.lane.b32.xlu1 %v242_v9, %s1128_s15 }
  0x74   : > { %v362_v13 = vpop.permute.xlu2 %361 }
  0x7c   : > { %v364_v14 = vpop.permute.xlu2 %363 }
  0x7d   : > { %v370_v19 = vsel %vm369_vm3, %v362_v13, %v364_v14 }
  0x7e   : > { %v377_v26 = vsel %vm259_vm1, %v370_v19, 0 }
  0x84   : > { %v430_v16 = vpop.permute.xlu2 %429 }
  0x8b   : > { %v248_v17 = vpop.permute.xlu1 %247  ;;  %v244_v18 = vpop.permute.xlu0 %243 }
  0x8c   : > { %v498_v20 = vpop.permute.xlu2 %497 }
  0x93   : > { %v250_v21 = vpop.permute.xlu1 %249  ;;  %v246_v22 = vpop.permute.xlu0 %245 }
  0x94   : > { %v252_v23 = vsel %vm251_vm4, %v244_v18, %v246_v22  ;;  %v254_v24 = vsel %vm251_vm4, %v248_v17, %v250_v21  ;;  %v253_v25 = vsel %vm251_vm4, %v246_v22, %v248_v17  ;;  %v502_v32 = vpop.permute.xlu2 %501 }
  0x95   : > { %v261_v27 = vsel %vm259_vm1, %v252_v23, 0  ;;  %v267_v28 = vsel %vm259_vm1, %v254_v24, 0  ;;  %v264_v29 = vsel %vm259_vm1, %v253_v25, 0  ;;  %v1078_v24 = vld [vmem:[%s1441_s1 + $0x18] sm:$0xf] }
  0x96   : > { %276 = vmatpush.bf16.msra.mxu1 %v261_v27  ;;  %302 = vmatpush.bf16.msra.mxu2 %v267_v28 }
  0x99   : > { %1056 = vmatmul.msk.bf16.vlgmr.msra.gmra.mxu1 %vm255_vm2, %v1055_v30  ;;  %1058 = vmatmul.msk.bf16.vlgmr.msra.gmra.mxu2 %vm255_vm2, %v1055_v30 }
  0x9a   : > { %289 = vmatpush.bf16.msrb.mxu1 %v264_v29  ;;  %392 = vmatpush.bf16.msrb.mxu2 %v377_v26 }
  0x9b   : > { %v366_v33 = vpop.permute.xlu0 %365  ;;  %v368_v34 = vpop.permute.xlu1 %367 }
  0x9c   : > { %v371_v35 = vsel %vm369_vm3, %v364_v14, %v366_v33  ;;  %v372_v36 = vsel %vm369_vm3, %v366_v33, %v368_v34  ;;  %v570_v40 = vpop.permute.xlu2 %569 }
  0x9d   : > { %v380_v37 = vsel %vm259_vm1, %v371_v35, 0  ;;  %v383_v38 = vsel %vm259_vm1, %v372_v36, 0  ;;  %v1082_v35 = vld [vmem:[%s1441_s1 + $0x1c] sm:$0xf]  ;;  %v1086_v36 = vld [vmem:[%s1441_s1 + $0x20] sm:$0xf] }
  0x9e   : > { %353 = vmatpush.bf16.msra.mxu1 %v318_v31  ;;  %405 = vmatpush.bf16.msrb.mxu3 %v380_v37 }
  0x9f   : > { %418 = vmatpush.bf16.msrb.mxu0 %v383_v38 }
  0xa1   : > { %1064 = vmatmul.msk.bf16.vlgmr.msrb.gmra.mxu3 %vm255_vm2, %v1062_v39 }
  0xa2   : > { %1065 = vmatmul.msk.bf16.vlgmr.msrb.gmra.mxu0 %vm255_vm2, %v1062_v39 }
  0xa3   : > { %v434_v41 = vpop.permute.xlu1 %433  ;;  %v432_v42 = vpop.permute.xlu0 %431 }
  0xa4   : > { %v438_v43 = vsel %vm437_vm5, %v430_v16, %v432_v42  ;;  %v439_v44 = vsel %vm437_vm5, %v432_v42, %v434_v41  ;;  %v634_v47 = vpop.permute.xlu2 %633 }
  0xa5   : > { %v448_v45 = vsel %vm259_vm1, %v439_v44, 0  ;;  %v445_v46 = vsel %vm259_vm1, %v438_v43, 0 }
  0xa6   : > { %473 = vmatpush.bf16.msra.mxu2 %v448_v45 }
  0xa9   : > { %1063 = vmatmul.msk.bf16.vlgmr.msrb.gmra.mxu2 %vm255_vm2, %v1062_v39  ;;  %1057 = vmatmul.msk.bf16.vlgmr.msrb.gmra.mxu1 %vm255_vm2, %v1055_v30  ;;  %v329_v39 = vpop.f32.mrf.mxu3 }
  0xaa   : > { %460 = vmatpush.bf16.msrb.mxu1 %v445_v46 }
  0xab   : > { %v436_v48 = vpop.permute.xlu1 %435  ;;  %v500_v49 = vpop.permute.xlu0 %499 }
  0xac   : > { %v440_v50 = vsel %vm437_vm5, %v434_v41, %v436_v48  ;;  %v506_v51 = vsel %vm505_vm6, %v498_v20, %v500_v49  ;;  %v640_v56 = vpop.permute.xlu2 %639  ;;  %v507_v59 = vsel %vm505_vm6, %v500_v49, %v502_v32  ;;  %v342_v41 = vpop.f32.mrf.mxu0 }
  0xad   : > { %v451_v52 = vsel %vm259_vm1, %v440_v50, 0  ;;  %v513_v53 = vsel %vm259_vm1, %v506_v51, 0  ;;  %v516_v0 = vsel %vm259_vm1, %v507_v59, 0  ;;  %v1129_v59 = vmov 1.0  }
  0xae   : > { %486 = vmatpush.bf16.msra.mxu3 %v451_v52  ;;  %528 = vmatpush.bf16.msra.mxu0 %v513_v53 }
  0xb1   : > { %1069 = vmatmul.msk.bf16.vlgmr.msra.gmra.mxu3 %vm255_vm2, %v1066_v54 }
  0xb2   : > { %1071 = vmatmul.msk.bf16.vlgmr.msra.gmra.mxu0 %vm255_vm2, %v1237_v55 }
  0xb3   : > { %v504_v57 = vpop.permute.xlu0 %503  ;;  %v568_v58 = vpop.permute.xlu1 %567 }
  0xb4   : > { %v508_v60 = vsel %vm505_vm6, %v502_v32, %v504_v57  ;;  %v575_v61 = vsel %vm573_vm7, %v568_v58, %v570_v40  ;;  %v706_v1 = vpop.permute.xlu2 %705  ;;  %v344_v42 = vpop.f32.mrf.mxu0 }
  0xb5   : > { %v519_v62 = vsel %vm259_vm1, %v508_v60, 0  ;;  %v584_v63 = vsel %vm259_vm1, %v575_v61, 0 }
  0xb6   : > { %554 = vmatpush.bf16.msrb.mxu2 %v519_v62  ;;  %609 = vmatpush.bf16.msrb.mxu0 %v584_v63 }
  0xb9   : > { %1061 = vmatmul.msk.bf16.vlgmr.msra.gmra.mxu1 %vm255_vm2, %v1196_v12  ;;  %1068 = vmatmul.msk.bf16.vlgmr.msra.gmra.mxu2 %vm255_vm2, %v1066_v54 }
  0xba   : > { %541 = vmatpush.bf16.msra.mxu1 %v516_v0 }
  0xbb   : > { %v566_v2 = vpop.permute.xlu0 %565  ;;  %v572_v3 = vpop.permute.xlu1 %571 }
  0xbc   : > { %v574_v4 = vsel %vm573_vm7, %v566_v2, %v568_v58  ;;  %v708_v7 = vpop.permute.xlu2 %707  ;;  %v576_v9 = vsel %vm573_vm7, %v570_v40, %v572_v3  ;;  %v331_v40 = vpop.f32.mrf.mxu3 }
  0xbd   : > { %v581_v5 = vsel %vm259_vm1, %v574_v4, 0  ;;  %v712_v8 = vsel %vm709_vm8, %v706_v1, %v708_v7  ;;  %v587_v19 = vsel %vm259_vm1, %v576_v9, 0 }
  0xbe   : > { %596 = vmatpush.bf16.msrb.mxu3 %v581_v5  ;;  %v723_v15 = vsel %vm259_vm1, %v712_v8, 0 }
  0xc1   : > { %1075 = vmatmul.msk.bf16.vlgmr.msrb.gmra.mxu3 %vm255_vm2, %v1074_v6 }
  0xc2   : > { %1076 = vmatmul.msk.bf16.vlgmr.msrb.gmra.mxu0 %vm255_vm2, %v1074_v6 }
  0xc3   : > { %v638_v10 = vpop.permute.xlu1 %637  ;;  %v636_v11 = vpop.permute.xlu0 %635 }
  0xc4   : > { %v644_v12 = vsel %vm641_vm9, %v638_v10, %v640_v56  ;;  %v642_v13 = vsel %vm641_vm9, %v634_v47, %v636_v11  ;;  %v643_v14 = vsel %vm641_vm9, %v636_v11, %v638_v10 }
  0xc5   : > { %v655_v16 = vsel %vm259_vm1, %v644_v12, 0  ;;  %v649_v17 = vsel %vm259_vm1, %v642_v13, 0  ;;  %v652_v18 = vsel %vm259_vm1, %v643_v14, 0 }
  0xc6   : > { %677 = vmatpush.bf16.msra.mxu3 %v652_v18  ;;  %664 = vmatpush.bf16.msra.mxu2 %v649_v17 }
  0xc7   : > { %690 = vmatpush.bf16.msra.mxu0 %v655_v16 }
  0xc9   : > { %1067 = vmatmul.msk.bf16.vlgmr.msrb.gmra.mxu1 %vm255_vm2, %v1066_v54  ;;  %1073 = vmatmul.msk.bf16.vlgmr.msrb.gmra.mxu2 %vm255_vm2, %v1237_v55 }
  0xca   : > { %758 = vmatpush.bf16.msrb.mxu3 %v723_v15  ;;  %622 = vmatpush.bf16.msrb.mxu1 %v587_v19 }
  0xcb   : > { %v702_v20 = vpop.permute.xlu0 %701  ;;  %v704_v21 = vpop.permute.xlu1 %703 }
  0xcc   : > { %v711_v22 = vsel %vm709_vm8, %v704_v21, %v706_v1  ;;  %v710_v27 = vsel %vm709_vm8, %v702_v20, %v704_v21 }
  0xcd   : > { %v720_v23 = vsel %vm259_vm1, %v711_v22, 0  ;;  %v717_v30 = vsel %vm259_vm1, %v710_v27, 0 }
  0xce   : > { %745 = vmatpush.bf16.msrb.mxu2 %v720_v23 }
  0xd1   : > { %1080 = vmatmul.msk.bf16.vlgmr.msra.gmra.mxu3 %vm255_vm2, %v1078_v24 }
  0xd2   : > { %1081 = vmatmul.msk.bf16.vlgmr.msra.gmra.mxu0 %vm255_vm2, %v1078_v24  ;;  %850 = vmatpush.msra.mxu3 %v1129_v59 }
  0xd3   : > { %v770_v25 = vpop.permute.xlu0 %769  ;;  %v772_v26 = vpop.permute.xlu1 %771 }
  0xd4   : > { %v778_v28 = vsel %vm777_vm10, %v770_v25, %v772_v26  ;;  %851 = vmatpush.msra.mxu3 %v1129_v59 }
  0xd5   : > { %v785_v29 = vsel %vm259_vm1, %v778_v28, 0 }
  0xd6   : > { %800 = vmatpush.bf16.msrb.mxu0 %v785_v29  ;;  %852 = vmatpush.msra.mxu3 %v1129_v59 }
  0xd8   : > { %853 = vmatpush.msra.mxu3 %v1129_v59 }
  0xd9   : > { %1072 = vmatmul.msk.bf16.vlgmr.msra.gmra.mxu1 %vm255_vm2, %v1237_v55  ;;  %1079 = vmatmul.msk.bf16.vlgmr.msra.gmra.mxu2 %vm255_vm2, %v1078_v24 }
  0xda   : > { %732 = vmatpush.bf16.msra.mxu1 %v717_v30  ;;  %870 = vmatpush.msra.mxu0 %v1129_v59 }
  0xdb   : > { %v774_v31 = vpop.permute.xlu0 %773  ;;  %v776_v32 = vpop.permute.xlu1 %775  ;;  %854 = vmatpush.msra.mxu3 %v1129_v59 }
  0xdc   : > { %v780_v33 = vsel %vm777_vm10, %v774_v31, %v776_v32  ;;  %v779_v37 = vsel %vm777_vm10, %v772_v26, %v774_v31  ;;  %871 = vmatpush.msra.mxu0 %v1129_v59 }
  0xdd   : > { %v791_v34 = vsel %vm259_vm1, %v780_v33, 0  ;;  %v788_v38 = vsel %vm259_vm1, %v779_v37, 0  ;;  %855 = vmatpush.msra.mxu3 %v1129_v59 }
  0xde   : > { %826 = vmatpush.bf16.msra.mxu2 %v791_v34  ;;  %872 = vmatpush.msra.mxu0 %v1129_v59 }
  0xdf   : > { %856 = vmatpush.msra.mxu3 %v1129_v59 }
  0xe0   : > { %873 = vmatpush.msra.mxu0 %v1129_v59 }
  0xe1   : > { %1085 = vmatmul.msk.bf16.vlgmr.msrb.gmra.mxu3 %vm255_vm2, %v1082_v35 }
  0xe2   : > { %1087 = vmatmul.msk.bf16.vlgmr.msrb.gmra.mxu0 %vm255_vm2, %v1086_v36  ;;  %857 = vmatpush.msra.mxu3 %v1129_v59 }
  0xe3   : > { %874 = vmatpush.msra.mxu0 %v1129_v59 }
  0xe4   : > { %858 = vmatpush.msra.mxu3 %v1129_v59 }
  0xe5   : > { %875 = vmatpush.msra.mxu0 %v1129_v59 }
  0xe6   : > { %859 = vmatpush.msra.mxu3 %v1129_v59 }
  0xe7   : > { %876 = vmatpush.msra.mxu0 %v1129_v59 }
  0xe8   : > { %860 = vmatpush.msra.mxu3 %v1129_v59 }
  0xe9   : > { %1077 = vmatmul.msk.bf16.vlgmr.msrb.gmra.mxu1 %vm255_vm2, %v1074_v6  ;;  %1084 = vmatmul.msk.bf16.vlgmr.msrb.gmra.mxu2 %vm255_vm2, %v1082_v35 }
  0xea   : > { %813 = vmatpush.bf16.msrb.mxu1 %v788_v38  ;;  %917 = vmatpush.msrb.mxu2 %v1129_v59 }
  0xeb   : > { %877 = vmatpush.msra.mxu0 %v1129_v59  ;;  %861 = vmatpush.msra.mxu3 %v1129_v59 }
  0xec   : > { %918 = vmatpush.msrb.mxu2 %v1129_v59 }
  0xed   : > { %878 = vmatpush.msra.mxu0 %v1129_v59  ;;  %862 = vmatpush.msra.mxu3 %v1129_v59 }
  0xee   : > { %919 = vmatpush.msrb.mxu2 %v1129_v59 }
  0xef   : > { %879 = vmatpush.msra.mxu0 %v1129_v59  ;;  %863 = vmatpush.msra.mxu3 %v1129_v59 }
  0xf0   : > { %920 = vmatpush.msrb.mxu2 %v1129_v59 }
  0xf1   : > { %880 = vmatpush.msra.mxu0 %v1129_v59  ;;  %864 = vmatpush.msra.mxu3 %v1129_v59 }
  0xf2   : > { %921 = vmatpush.msrb.mxu2 %v1129_v59 }
  0xf3   : > { %881 = vmatpush.msra.mxu0 %v1129_v59  ;;  %865 = vmatpush.msra.mxu3 %v1129_v59 }
  0xf4   : > { %922 = vmatpush.msrb.mxu2 %v1129_v59 }
  0xf5   : > { %882 = vmatpush.msra.mxu0 %v1129_v59  ;;  %937 = vmatpush.msrb.mxu3 %v1129_v59 }
  0xf6   : > { %923 = vmatpush.msrb.mxu2 %v1129_v59 }
  0xf7   : > { %883 = vmatpush.msra.mxu0 %v1129_v59  ;;  %938 = vmatpush.msrb.mxu3 %v1129_v59 }
  0xf8   : > { %924 = vmatpush.msrb.mxu2 %v1129_v59 }
  0xf9   : > { %1083 = vmatmul.msk.bf16.vlgmr.msra.gmra.mxu1 %vm255_vm2, %v1082_v35  ;;  %1089 = vmatmul.msk.bf16.vlgmr.msra.gmra.mxu2 %vm255_vm2, %v1086_v36 }
  0xfa   : > { %890 = vmatpush.msra.mxu1 %v1129_v59  ;;  %925 = vmatpush.msrb.mxu2 %v1129_v59 }
  0xfb   : > { %884 = vmatpush.msra.mxu0 %v1129_v59  ;;  %939 = vmatpush.msrb.mxu3 %v1129_v59 }
  0xfc   : > { %891 = vmatpush.msra.mxu1 %v1129_v59  ;;  %926 = vmatpush.msrb.mxu2 %v1129_v59 }
  0xfd   : > { %885 = vmatpush.msra.mxu0 %v1129_v59  ;;  %940 = vmatpush.msrb.mxu3 %v1129_v59 }
  0xfe   : > { %892 = vmatpush.msra.mxu1 %v1129_v59  ;;  %927 = vmatpush.msrb.mxu2 %v1129_v59 }
  0xff   : > { %957 = vmatpush.msrb.mxu0 %v1129_v59  ;;  %941 = vmatpush.msrb.mxu3 %v1129_v59 }
 0x100   : > { %893 = vmatpush.msra.mxu1 %v1129_v59  ;;  %928 = vmatpush.msrb.mxu2 %v1129_v59 }
 0x101   : > { %958 = vmatpush.msrb.mxu0 %v1129_v59  ;;  %942 = vmatpush.msrb.mxu3 %v1129_v59 }
 0x102   : > { %894 = vmatpush.msra.mxu1 %v1129_v59  ;;  %929 = vmatpush.msrb.mxu2 %v1129_v59 }
 0x103   : > { %959 = vmatpush.msrb.mxu0 %v1129_v59  ;;  %943 = vmatpush.msrb.mxu3 %v1129_v59 }
 0x104   : > { %895 = vmatpush.msra.mxu1 %v1129_v59  ;;  %930 = vmatpush.msrb.mxu2 %v1129_v59 }
 0x105   : > { %960 = vmatpush.msrb.mxu0 %v1129_v59  ;;  %944 = vmatpush.msrb.mxu3 %v1129_v59 }
 0x106   : > { %896 = vmatpush.msra.mxu1 %v1129_v59  ;;  %931 = vmatpush.msrb.mxu2 %v1129_v59 }
 0x107   : > { %961 = vmatpush.msrb.mxu0 %v1129_v59  ;;  %945 = vmatpush.msrb.mxu3 %v1129_v59 }
 0x108   : > { %897 = vmatpush.msra.mxu1 %v1129_v59  ;;  %932 = vmatpush.msrb.mxu2 %v1129_v59 }
 0x109   : > { %1088 = vmatmul.msk.bf16.vlgmr.msrb.gmra.mxu1 %vm255_vm2, %v1086_v36  ;;  %962 = vmatpush.msrb.mxu0 %v1129_v59 }
 0x10a   : > { %898 = vmatpush.msra.mxu1 %v1129_v59  ;;  %946 = vmatpush.msrb.mxu3 %v1129_v59 }
 0x10b   : > { %963 = vmatpush.msrb.mxu0 %v1129_v59 }
 0x10c   : > { %899 = vmatpush.msra.mxu1 %v1129_v59  ;;  %947 = vmatpush.msrb.mxu3 %v1129_v59 }
 0x10d   : > { %964 = vmatpush.msrb.mxu0 %v1129_v59 }
 0x10e   : > { %900 = vmatpush.msra.mxu1 %v1129_v59  ;;  %948 = vmatpush.msrb.mxu3 %v1129_v59 }
 0x10f   : > { %965 = vmatpush.msrb.mxu0 %v1129_v59 }
 0x110   : > { %901 = vmatpush.msra.mxu1 %v1129_v59  ;;  %949 = vmatpush.msrb.mxu3 %v1129_v59 }
 0x111   : > { %966 = vmatpush.msrb.mxu0 %v1129_v59 }
 0x112   : > { %902 = vmatpush.msra.mxu1 %v1129_v59  ;;  %950 = vmatpush.msrb.mxu3 %v1129_v59 }
 0x113   : > { %967 = vmatpush.msrb.mxu0 %v1129_v59 }
 0x114   : > { %903 = vmatpush.msra.mxu1 %v1129_v59  ;;  %951 = vmatpush.msrb.mxu3 %v1129_v59 }
 0x115   : > { %968 = vmatpush.msrb.mxu0 %v1129_v59 }
 0x116   : > { %v278_v43 = vpop.f32.mrf.mxu1  ;;  %904 = vmatpush.msra.mxu1 %v1129_v59  ;;  %952 = vmatpush.msrb.mxu3 %v1129_v59 }
 0x117   : > { %v330_v44 = vadd.f32 %v329_v39, %v278_v43  ;;  %969 = vmatpush.msrb.mxu0 %v1129_v59  ;;  %v835_v39 = vld [vmem:[%s1442_s2] sm:$0x7] }
 0x118   : > { %905 = vmatpush.msra.mxu1 %v1129_v59 }
 0x119   : > { %970 = vmatpush.msrb.mxu0 %v1129_v59 }
 0x11b   : > { %971 = vmatpush.msrb.mxu0 %v1129_v59 }
 0x11c   : > { %v304_v45 = vpop.f32.mrf.mxu2 }
 0x11d   : > { %972 = vmatpush.msrb.mxu0 %v1129_v59 }
 0x11e   : > { %v280_v46 = vpop.f32.mrf.mxu1 }
 0x11f   : > { %v420_v47 = vpop.f32.mrf.mxu0 }
 0x124   : > { %v306_v48 = vpop.f32.mrf.mxu2  ;;  %v407_v49 = vpop.f32.mrf.mxu3 }
 0x125   : > { %v839_v48 = vperm.slane %v835_v39, 2 }
 0x126   : > { %v291_v50 = vpop.f32.mrf.mxu1 }
 0x127   : > { %v422_v51 = vpop.f32.mrf.mxu0  ;;  %v343_v52 = vadd.f32 %v342_v41, %v291_v50 }
 0x129   : > { %v425_v53 = vadd.f32 %v407_v49, %v343_v52 }
 0x12c   : > { %v394_v54 = vpop.f32.mrf.mxu2  ;;  %v409_v55 = vpop.f32.mrf.mxu3 }
 0x12d   : > { %v1299_v56 = vadd.f32 %v394_v54, %v330_v44  ;;  %v837_v44 = vperm.slane %v835_v39, 0 }
 0x12e   : > { %v293_v57 = vpop.f32.mrf.mxu1 }
 0x12f   : > { %v1301_v58 = vpop.f32.mrf.mxu0  ;;  %v838_v57 = vperm.slane %v835_v39, 1 }
 0x134   : > { %v396_v60 = vpop.f32.mrf.mxu2  ;;  %v1313_v61 = vpop.f32.mrf.mxu3 }
 0x136   : > { %v355_v62 = vpop.f32.mrf.mxu1 }
 0x137   : > { %v532_v63 = vpop.f32.mrf.mxu0  ;;  %v356_v0 = vadd.f32 %v355_v62, %v304_v45 }
 0x139   : > { %v1325_v1 = vadd.f32 %v420_v47, %v356_v0 }
 0x13b   : > { %v494_v34 = vadd.f32 %v1313_v61, %v1325_v1 }
 0x13c   : > { %v475_v2 = vpop.f32.mrf.mxu2  ;;  %v490_v3 = vpop.f32.mrf.mxu3 }
 0x13d   : > { %v1335_v4 = vadd.f32 %v475_v2, %v425_v53 }
 0x13e   : > { %v357_v5 = vpop.f32.mrf.mxu1 }
 0x13f   : > { %v611_v6 = vpop.f32.mrf.mxu0 }
 0x144   : > { %v477_v7 = vpop.f32.mrf.mxu2  ;;  %v1351_v8 = vpop.f32.mrf.mxu3 }
 0x146   : > { %v462_v9 = vpop.f32.mrf.mxu1 }
 0x147   : > { %v613_v10 = vpop.f32.mrf.mxu0  ;;  %v492_v11 = vadd.f32 %v462_v9, %v1299_v56 }
 0x148   : > { %v913_v10 = vld [vmem:[%s1445_s5] sm:$0xff] }
 0x149   : > { %v1365_v12 = vadd.f32 %v1301_v58, %v492_v11 }
 0x14b   : > { %v628_v36 = vadd.f32 %v1351_v8, %v1365_v12 }
 0x14c   : > { %v556_v13 = vpop.f32.mrf.mxu2  ;;  %v600_v14 = vpop.f32.mrf.mxu3 }
 0x14d   : > { %v562_v35 = vadd.f32 %v556_v13, %v494_v34 }
 0x14e   : > { %v464_v15 = vpop.f32.mrf.mxu1 }
 0x14f   : > { %v692_v16 = vpop.f32.mrf.mxu0 }
 0x154   : > { %v558_v17 = vpop.f32.mrf.mxu2  ;;  %v1385_v18 = vpop.f32.mrf.mxu3 }
 0x156   : > { %v543_v19 = vpop.f32.mrf.mxu1 }
 0x157   : > { %v694_v20 = vpop.f32.mrf.mxu0  ;;  %v561_v21 = vadd.f32 %v543_v19, %v1335_v4  ;;  %v849_v4 = vld [vmem:[%s1444_s4] sm:$0xff] }
 0x159   : > { %v629_v22 = vadd.f32 %v611_v6, %v561_v21 }
 0x15b   : > { %v697_v54 = vadd.f32 %v1385_v18, %v629_v22 }
 0x15c   : > { %v666_v23 = vpop.f32.mrf.mxu2  ;;  %v681_v24 = vpop.f32.mrf.mxu3 }
 0x15d   : > { %v696_v40 = vadd.f32 %v666_v23, %v628_v36 }
 0x15e   : > { %v545_v25 = vpop.f32.mrf.mxu1 }
 0x15f   : > { %v802_v26 = vpop.f32.mrf.mxu0 }
 0x164   : > { %v668_v27 = vpop.f32.mrf.mxu2  ;;  %v760_v28 = vpop.f32.mrf.mxu3 }
 0x166   : > { %v624_v29 = vpop.f32.mrf.mxu1 }
 0x167   : > { %v804_v30 = vpop.f32.mrf.mxu0  ;;  %v630_v37 = vadd.f32 %v624_v29, %v562_v35 }
 0x169   : > { %v698_v42 = vadd.f32 %v692_v16, %v630_v37 }
 0x16b   : > { %v766_v46 = vadd.f32 %v760_v28, %v698_v42 }
 0x16c   : > { %v747_v31 = vpop.f32.mrf.mxu2  ;;  %v762_v32 = vpop.f32.mrf.mxu3 }
 0x16d   : > { %v765_v56 = vadd.f32 %v747_v31, %v697_v54 }
 0x16e   : > { %v626_v33 = vpop.f32.mrf.mxu1 }
 0x174   : > { %v749_v38 = vpop.f32.mrf.mxu2 }
 0x176   : > { %v734_v41 = vpop.f32.mrf.mxu1 }
 0x177   : > { %v764_v43 = vadd.f32 %v734_v41, %v696_v40 }
 0x179   : > { %v832_v45 = vadd.f32 %v802_v26, %v764_v43 }
 0x17b   : > { %v843_v47 = vmul.f32 %v837_v44, %v832_v45 }
 0x17c   : > { %v828_v49 = vpop.f32.mrf.mxu2 }
 0x17d   : > { %846 = vst [vmem:[%s1174_s28] sm:$0xff] %v843_v47  ;;  %v914_v50 = vmul.f32 %v843_v47, %v843_v47  ;;  %v834_v51 = vadd.f32 %v828_v49, %v766_v46  ;;  %866 = vmatmul.f32.vlgmr.msra.gmra.mxu3 %v843_v47 }
 0x17e   : > { %v736_v52 = vpop.f32.mrf.mxu1 }
 0x17f   : > { %v845_v53 = vmul.f32 %v839_v48, %v834_v51  ;;  %933 = vmatmul.f32.vlgmr.msrb.gmra.mxu2 %v914_v50 }
 0x181   : > { %848 = vst [vmem:[%s1174_s28 + $0x10] sm:$0xff] %v845_v53  ;;  %906 = vmatmul.f32.vlgmr.msra.gmra.mxu1 %v845_v53  ;;  %v916_v63 = vmul.f32 %v845_v53, %v845_v53 }
 0x184   : > { %v830_v55 = vpop.f32.mrf.mxu2 }
 0x186   : > { %v815_v58 = vpop.f32.mrf.mxu1 }
 0x187   : > { %v833_v59 = vadd.f32 %v815_v58, %v765_v56 }
 0x189   : > { %v844_v60 = vmul.f32 %v838_v57, %v833_v59 }
 0x18b   : > { %847 = vst [vmem:[%s1174_s28 + $0x8] sm:$0xff] %v844_v60  ;;  %v915_v61 = vmul.f32 %v844_v60, %v844_v60  ;;  %886 = vmatmul.f32.vlgmr.msra.gmra.mxu0 %v844_v60 }
 0x18d   : > { %953 = vmatmul.f32.vlgmr.msrb.gmra.mxu3 %v915_v61 }
 0x18e   : > { %v817_v62 = vpop.f32.mrf.mxu1 }
 0x193   : > { %973 = vmatmul.f32.vlgmr.msrb.gmra.mxu0 %v916_v63 }
 0x1fe   : > { %v907_v3 = vpop.f32.mrf.mxu1 }
 0x200   : > { %v867_v0 = vpop.f32.mrf.mxu3 }
 0x202   : > { %v934_v7 = vpop.f32.mrf.mxu2 }
 0x208   : > { %v887_v1 = vpop.f32.mrf.mxu0 }
 0x209   : > { %v888_v2 = vadd.f32 %v887_v1, %v867_v0 }
 0x20b   : > { %v908_v5 = vadd.f32 %v907_v3, %v888_v2 }
 0x20d   : > { %v910_v6 = vadd.f32 %v908_v5, %v849_v4 }
 0x20f   : > { %912 = vst.msk [vmem:[%s1444_s4] sm:$0xff] %vm911_vm11, %v910_v6 }
 0x210   : > { %v954_v8 = vpop.f32.mrf.mxu3  ;;  %v974_v11 = vpop.f32.mrf.mxu0 }
 0x211   : > { %v955_v9 = vadd.f32 %v954_v8, %v934_v7 }
 0x213   : > { %v975_v12 = vadd.f32 %v974_v11, %v955_v9 }
 0x215   : > { %v977_v13 = vadd.f32 %v975_v12, %v913_v10 }
 0x217   : > { %978 = vst.msk [vmem:[%s1445_s5] sm:$0xff] %vm911_vm11, %v977_v13 }
 0x218 PF: > { %s16_s18 = sadd.s32 1, %s1118_s18  }
 0x219   : > { %p13_p5 = scmp.ge.s32.totalorder %s16_s18, 4  }
 0x21b   :  { %15 = sbr.rel (!%p13_p5) target bundleno = 1 (0x1), region = 90 }

</bundles_post_ra>
